<compile_context>
chip_gen: v7x
topology: tpu7x:2x2x1
jax: 0.10.0
libtpu: 0.0.40
codegen_flags: <defaults>
</compile_context>

<pallas_src>
import jax
import jax.numpy as jnp
from jax.experimental import pallas as pl
from jax.experimental.pallas import tpu as pltpu


# ----------------------------- helpers ---------------------------------------

def _round_up(x, m):
    return ((x + m - 1) // m) * m


def _leaky_relu(x, slope=0.2):
    return jnp.where(x >= 0, x, slope * x)


def _softplus(x):
    # EUP-friendly stable softplus: one exp + one log1p per element.
    return jnp.maximum(x, 0.0) + jnp.log1p(jnp.exp(-jnp.abs(x)))


def vae_layout(input_dim, layers_data, latent_dim):
    """Static column layout shared by pack / kernel / wrapper."""
    D = _round_up(max([input_dim] + list(layers_data) + [latent_dim]), 128)
    ID, L = input_dim, latent_dim
    lm_off = 3 * ID                    # latent_mean columns in the output slab
    lv_off = 3 * ID + L                # logvar columns in the output slab
    OW = _round_up(3 * ID + 2 * L, 128)        # packed output width (lane-dense)
    split = (lm_off // 128) * 128              # 128-aligned start of the "latent" tail blocks
    eps_in_x = (ID + L <= D)                   # pack eps into unused lanes of the x slab?
    c_z = ID if eps_in_x else 0                # lane offset of the latent code in z
    return dict(D=D, OW=OW, split=split, lm_off=lm_off, lv_off=lv_off,
                eps_in_x=eps_in_x, c_z=c_z,
                n_enc=len(layers_data), n_dec=len(layers_data))


# ----------------------------- kernel ----------------------------------------

def make_vae_kernel(n_enc, n_dec, d_pad, input_dim, out_width, split, eps_in_x):
    D = d_pad
    ID = input_dim
    OW = out_width

    def body(x, eps_src, enc_w, enc_b, ench_w, ench_b,
             dec_w, dec_b, dech_w, dech_b, out_ref):
        # ---- encode (statically unrolled MLP, one MXU push per layer) ----
        h = x
        for i in range(n_enc):
            y = jnp.dot(h, enc_w[i], preferred_element_type=jnp.float32) + enc_b[i]
            h = _leaky_relu(y)

        # fused encoder head: one (TB, D) x (D, 2D + tail) matmul producing
        #   block0 = mu (reparam lanes), block1 = logvar (reparam lanes),
        #   tail   = mu|logvar already placed at their output-slab lane positions.
        head = jnp.dot(h, ench_w[...], preferred_element_type=jnp.float32) + ench_b[...]

        # ---- reparameterization (matches the PyTorch code: z = mean + logvar * eps) ----
        # eps_src has eps at exactly the lanes where mu/logvar live; all other
        # lanes of the mu/logvar blocks are zero, so stray values are harmless.
        z = head[:, :D] + head[:, D:2 * D] * eps_src
        latent_out = head[:, 2 * D:]            # (TB, OW - split), lane-aligned tail

        # ---- decode ----
        h = z
        for i in range(n_dec):
            y = jnp.dot(h, dec_w[i], preferred_element_type=jnp.float32) + dec_b[i]
            h = _leaky_relu(y)

        # fused decoder head: mean|disp|pi tightly packed in columns at pack time.
        dh = jnp.dot(h, dech_w[...], preferred_element_type=jnp.float32) + dech_b[...]

        # TODO(synk): MeanAct / DispAct are not defined in the provided snippet;
        # standard ZINB-VAE definitions are used: clamp(exp(x)) / clamp(softplus(x)).
        col = jax.lax.broadcasted_iota(jnp.int32, dh.shape, 1)
        mean_act = jnp.clip(jnp.exp(dh), 1e-5, 1e6)
        disp_act = jnp.clip(_softplus(dh), 1e-4, 1e4)
        pi_act = jax.nn.sigmoid(dh)
        dh_act = jnp.where(col < ID, mean_act, 0.0)
        dh_act = dh_act + jnp.where((col >= ID) & (col < 2 * ID), disp_act, 0.0)
        dh_act = dh_act + jnp.where((col >= 2 * ID) & (col < 3 * ID), pi_act, 0.0)

        # Direct, 128-aligned, unmasked stores (no concatenate / no 5*D temp).
        if split > 0:
            out_ref[:, :split] = dh_act[:, :split]
        out_ref[:, split:] = dh_act[:, split:] + latent_out

    if eps_in_x:
        def kernel(x_ref, enc_w, enc_b, ench_w, ench_b,
                   dec_w, dec_b, dech_w, dech_b, out_ref):
            x = x_ref[...]
            body(x, x, enc_w, enc_b, ench_w, ench_b,
                 dec_w, dec_b, dech_w, dech_b, out_ref)
    else:
        def kernel(x_ref, eps_ref, enc_w, enc_b, ench_w, ench_b,
                   dec_w, dec_b, dech_w, dech_b, out_ref):
            body(x_ref[...], eps_ref[...], enc_w, enc_b, ench_w, ench_b,
                 dec_w, dec_b, dech_w, dech_b, out_ref)

    return kernel


# ----------------------------- params ----------------------------------------

def init_linear(key, in_dim, out_dim):
    """nn.Linear-like init: U(-1/sqrt(in), 1/sqrt(in)); weights stored (in, out)."""
    kw, kb = jax.random.split(key)
    bound = 1.0 / jnp.sqrt(jnp.float32(in_dim))
    w = jax.random.uniform(kw, (in_dim, out_dim), jnp.float32, -bound, bound)
    b = jax.random.uniform(kb, (1, out_dim), jnp.float32, -bound, bound)
    return w, b


def init_vae_params(key, input_dim, layers_data, latent_dim):
    params = {}
    keys = jax.random.split(key, 2 * len(layers_data) + 5)
    k_iter = iter(keys)

    enc = []
    prev = input_dim
    for size in layers_data:
        enc.append(init_linear(next(k_iter), prev, size))
        prev = size
    params["enc"] = enc
    params["enc_mu"] = init_linear(next(k_iter), layers_data[-1], latent_dim)
    params["enc_logvar"] = init_linear(next(k_iter), layers_data[-1], latent_dim)

    rev = list(reversed(layers_data))
    dec = []
    prev = latent_dim
    for size in rev:
        dec.append(init_linear(next(k_iter), prev, size))
        prev = size
    params["dec"] = dec
    params["dec_mean"] = init_linear(next(k_iter), rev[-1], input_dim)
    params["dec_disp"] = init_linear(next(k_iter), rev[-1], input_dim)
    params["dec_pi"] = init_linear(next(k_iter), rev[-1], input_dim)
    return params


def pack_vae_params(params, input_dim, layers_data, latent_dim):
    """Pack per-layer weights into a few padded, fused, lane-dense slabs."""
    lay = vae_layout(input_dim, layers_data, latent_dim)
    D, OW, split = lay["D"], lay["OW"], lay["split"]
    lm, lv, c_z = lay["lm_off"], lay["lv_off"], lay["c_z"]
    L, ID = latent_dim, input_dim
    HW = 2 * D + (OW - split)

    def pad2(a, rows, cols, row_off=0, col_off=0):
        out = jnp.zeros((rows, cols), jnp.float32)
        return out.at[row_off:row_off + a.shape[0],
                      col_off:col_off + a.shape[1]].set(a)

    # stacked encoder MLP weights / biases, padded to (D, D) / (1, D)
    enc_w = jnp.stack([pad2(w, D, D) for (w, _) in params["enc"]])
    enc_b = jnp.stack([pad2(b, 1, D) for (_, b) in params["enc"]])

    # fused encoder head: reparam blocks + output-layout tail block(s)
    mu_w, mu_b = params["enc_mu"]
    lv_w, lv_b = params["enc_logvar"]
    ench_w = jnp.zeros((D, HW), jnp.float32)
    ench_w = ench_w.at[:mu_w.shape[0], c_z:c_z + L].set(mu_w)
    ench_w = ench_w.at[:lv_w.shape[0], D + c_z:D + c_z + L].set(lv_w)
    ench_w = ench_w.at[:mu_w.shape[0], 2 * D + (lm - split):2 * D + (lm - split) + L].set(mu_w)
    ench_w = ench_w.at[:lv_w.shape[0], 2 * D + (lv - split):2 * D + (lv - split) + L].set(lv_w)
    ench_b = jnp.zeros((1, HW), jnp.float32)
    ench_b = ench_b.at[:, c_z:c_z + L].set(mu_b)
    ench_b = ench_b.at[:, D + c_z:D + c_z + L].set(lv_b)
    ench_b = ench_b.at[:, 2 * D + (lm - split):2 * D + (lm - split) + L].set(mu_b)
    ench_b = ench_b.at[:, 2 * D + (lv - split):2 * D + (lv - split) + L].set(lv_b)

    # stacked decoder MLP weights / biases (layer 0 rows shifted to the z lanes)
    dec_ws, dec_bs = [], []
    for i, (w, b) in enumerate(params["dec"]):
        dec_ws.append(pad2(w, D, D, row_off=(c_z if i == 0 else 0)))
        dec_bs.append(pad2(b, 1, D))
    dec_w = jnp.stack(dec_ws)
    dec_b = jnp.stack(dec_bs)

    # fused decoder head: mean / disp / pi packed tightly in columns
    dm_w, dm_b = params["dec_mean"]
    dd_w, dd_b = params["dec_disp"]
    dp_w, dp_b = params["dec_pi"]
    dech_w = jnp.zeros((D, OW), jnp.float32)
    dech_w = dech_w.at[:dm_w.shape[0], 0:ID].set(dm_w)
    dech_w = dech_w.at[:dd_w.shape[0], ID:2 * ID].set(dd_w)
    dech_w = dech_w.at[:dp_w.shape[0], 2 * ID:3 * ID].set(dp_w)
    dech_b = jnp.zeros((1, OW), jnp.float32)
    dech_b = dech_b.at[:, 0:ID].set(dm_b)
    dech_b = dech_b.at[:, ID:2 * ID].set(dd_b)
    dech_b = dech_b.at[:, 2 * ID:3 * ID].set(dp_b)

    return (enc_w, enc_b, ench_w, ench_b, dec_w, dec_b, dech_w, dech_b)


# ----------------------------- wrapper ----------------------------------------

def make_vae_forward(input_dim, layers_data, latent_dim, batch_tile=None):
    lay = vae_layout(input_dim, layers_data, latent_dim)
    D, OW, split = lay["D"], lay["OW"], lay["split"]
    lm_off, lv_off = lay["lm_off"], lay["lv_off"]
    eps_in_x, c_z = lay["eps_in_x"], lay["c_z"]
    n_enc, n_dec = lay["n_enc"], lay["n_dec"]
    HW = 2 * D + (OW - split)

    kernel = make_vae_kernel(n_enc, n_dec, D, input_dim, OW, split, eps_in_x)

    # VMEM-aware batch-tile cap (double-buffered streams + resident weights).
    weight_bytes = 4 * (n_enc * D * D + n_enc * D + D * HW + HW +
                        n_dec * D * D + n_dec * D + D * OW + OW)
    row_bytes = 4 * (D + OW + (0 if eps_in_x else D))
    budget = 24 * 1024 * 1024
    tb_cap = max(8, ((budget - 2 * weight_bytes) // (2 * row_bytes)) // 8 * 8)

    def forward(x, eps, packed):
        B = x.shape[0]
        if batch_tile is not None:
            TB = batch_tile
        else:
            # large tiles (amortize per-step overhead), but keep >=2 grid steps
            TB = int(min(1024, tb_cap, max(8, _round_up(-(-B // 2), 8))))
        # force >=2 grid steps so both v7x TensorCores get work
        B_pad = max(_round_up(B, TB), 2 * TB)

        # zero-padded lane-dense input slab; eps packed into its spare lanes
        x_p = jnp.zeros((B_pad, D), jnp.float32).at[:B, :input_dim].set(x)
        if eps_in_x:
            x_p = x_p.at[:B, c_z:c_z + latent_dim].set(eps)
            data_ins = (x_p,)
            data_specs = [pl.BlockSpec((TB, D), lambda i: (i, 0))]
        else:
            eps_p = jnp.zeros((B_pad, D), jnp.float32).at[:B, :latent_dim].set(eps)
            data_ins = (x_p, eps_p)
            data_specs = [pl.BlockSpec((TB, D), lambda i: (i, 0)),
                          pl.BlockSpec((TB, D), lambda i: (i, 0))]

        slab = pl.pallas_call(
            kernel,
            out_shape=jax.ShapeDtypeStruct((B_pad, OW), jnp.float32),
            grid=(B_pad // TB,),
            in_specs=data_specs + [
                pl.BlockSpec((n_enc, D, D), lambda i: (0, 0, 0)),   # enc W (resident)
                pl.BlockSpec((n_enc, 1, D), lambda i: (0, 0, 0)),   # enc b
                pl.BlockSpec((D, HW), lambda i: (0, 0)),            # fused enc head W
                pl.BlockSpec((1, HW), lambda i: (0, 0)),            # fused enc head b
                pl.BlockSpec((n_dec, D, D), lambda i: (0, 0, 0)),   # dec W (resident)
                pl.BlockSpec((n_dec, 1, D), lambda i: (0, 0, 0)),   # dec b
                pl.BlockSpec((D, OW), lambda i: (0, 0)),            # fused dec head W
                pl.BlockSpec((1, OW), lambda i: (0, 0)),            # fused dec head b
            ],
            out_specs=pl.BlockSpec((TB, OW), lambda i: (i, 0)),
            compiler_params=pltpu.CompilerParams(
                dimension_semantics=("parallel",),        # megacore split on v7x
                vmem_limit_bytes=32 * 1024 * 1024,
            ),
        )(*data_ins, *packed)

        # slice the packed lane-dense output slab back into the 5 logical outputs
        _mean = slab[:B, 0:input_dim]
        _disp = slab[:B, input_dim:2 * input_dim]
        _pi = slab[:B, 2 * input_dim:3 * input_dim]
        mean = slab[:B, lm_off:lm_off + latent_dim]
        logvar = slab[:B, lv_off:lv_off + latent_dim]
        return mean, logvar, _mean, _disp, _pi

    return jax.jit(forward)


# ----------------------------- reference (plain JAX) --------------------------

def vae_forward_ref(x, eps, params):
    def lin(h, wb):
        w, b = wb
        return h @ w + b

    h = x
    for wb in params["enc"]:
        y = lin(h, wb)
        h = jnp.where(y >= 0, y, 0.2 * y)
    mean = lin(h, params["enc_mu"])
    logvar = lin(h, params["enc_logvar"])
    z = mean + logvar * eps                        # matches the PyTorch reparameterization
    h = z
    for wb in params["dec"]:
        y = lin(h, wb)
        h = jnp.where(y >= 0, y, 0.2 * y)
    _mean = jnp.clip(jnp.exp(lin(h, params["dec_mean"])), 1e-5, 1e6)
    _disp = jnp.clip(jax.nn.softplus(lin(h, params["dec_disp"])), 1e-4, 1e4)
    _pi = jax.nn.sigmoid(lin(h, params["dec_pi"]))
    return mean, logvar, _mean, _disp, _pi


# ----------------------------- main -------------------------------------------

if __name__ == "__main__":
    input_dim = 64
    layers_data = [32, 16]
    latent_dim = 5
    batch = 8

    key = jax.random.PRNGKey(0)
    k_params, k_x, k_eps = jax.random.split(key, 3)

    params = init_vae_params(k_params, input_dim, layers_data, latent_dim)
    x = jax.random.normal(k_x, (batch, input_dim), jnp.float32)
    # PyTorch draws eps with randn_like inside forward(); we pass it explicitly
    # so the kernel and the reference are deterministic and comparable.
    eps = jax.random.normal(k_eps, (batch, latent_dim), jnp.float32)

    packed = pack_vae_params(params, input_dim, layers_data, latent_dim)
    forward = make_vae_forward(input_dim, layers_data, latent_dim)

    outs = jax.block_until_ready(forward(x, eps, packed))
    refs = vae_forward_ref(x, eps, params)
    for o, r in zip(outs, refs):
        assert o.shape == r.shape
        assert jnp.allclose(o, r, atol=1e-4, rtol=1e-4), "mismatch vs reference"

    print("KERNEL_OK")
</pallas_src>

<mosaic_0001>
module attributes {stable_mosaic.version = 11 : i64} {
  func.func @kernel(%arg0: i32, %arg1: memref<8x128xf32, #tpu.memory_space<vmem>>, %arg2: memref<2x128x128xf32, #tpu.memory_space<vmem>>, %arg3: memref<2x1x128xf32, #tpu.memory_space<vmem>>, %arg4: memref<128x384xf32, #tpu.memory_space<vmem>>, %arg5: memref<1x384xf32, #tpu.memory_space<vmem>>, %arg6: memref<2x128x128xf32, #tpu.memory_space<vmem>>, %arg7: memref<2x1x128xf32, #tpu.memory_space<vmem>>, %arg8: memref<128x256xf32, #tpu.memory_space<vmem>>, %arg9: memref<1x256xf32, #tpu.memory_space<vmem>>, %arg10: memref<8x256xf32, #tpu.memory_space<vmem>>) attributes {dimension_semantics = [#tpu.dimension_semantics<parallel>], iteration_bounds = array<i64: 2>, scalar_prefetch = 0 : i64, scratch_operands = 0 : i64, tpu.core_type = #tpu.core_type<tc>, window_params = [{transform_indices = @transform_0, window_bounds = array<i64: 8, 128>}, {pipeline_mode = #tpu.pipeline_mode<synchronous>, transform_indices = @transform_1, window_bounds = array<i64: 2, 128, 128>}, {pipeline_mode = #tpu.pipeline_mode<synchronous>, transform_indices = @transform_2, window_bounds = array<i64: 2, 1, 128>}, {pipeline_mode = #tpu.pipeline_mode<synchronous>, transform_indices = @transform_3, window_bounds = array<i64: 128, 384>}, {pipeline_mode = #tpu.pipeline_mode<synchronous>, transform_indices = @transform_4, window_bounds = array<i64: 1, 384>}, {pipeline_mode = #tpu.pipeline_mode<synchronous>, transform_indices = @transform_5, window_bounds = array<i64: 2, 128, 128>}, {pipeline_mode = #tpu.pipeline_mode<synchronous>, transform_indices = @transform_6, window_bounds = array<i64: 2, 1, 128>}, {pipeline_mode = #tpu.pipeline_mode<synchronous>, transform_indices = @transform_7, window_bounds = array<i64: 128, 256>}, {pipeline_mode = #tpu.pipeline_mode<synchronous>, transform_indices = @transform_8, window_bounds = array<i64: 1, 256>}, {transform_indices = @transform_9, window_bounds = array<i64: 8, 256>}]} {
    %c0 = arith.constant 0 : index
    %c0_0 = arith.constant 0 : index
    %0 = vector.load %arg1[%c0, %c0_0] : memref<8x128xf32, #tpu.memory_space<vmem>>, vector<8x128xf32>
    %c0_1 = arith.constant 0 : index
    %c0_2 = arith.constant 0 : index
    %c0_3 = arith.constant 0 : index
    %1 = vector.load %arg2[%c0_1, %c0_2, %c0_3] : memref<2x128x128xf32, #tpu.memory_space<vmem>>, vector<1x128x128xf32>
    %2 = vector.shape_cast %1 : vector<1x128x128xf32> to vector<128x128xf32>
    %cst = arith.constant dense<0.000000e+00> : vector<8x128xf32>
    %3 = tpu.matmul %0, %2, %cst {dimension_numbers = #tpu.dot_dimension_numbers<[1], [0], [0], [1], [0, 0, 1, 1], [], []>} : vector<8x128xf32>, vector<128x128xf32>, vector<8x128xf32> -> vector<8x128xf32>
    %c0_4 = arith.constant 0 : index
    %c0_5 = arith.constant 0 : index
    %c0_6 = arith.constant 0 : index
    %4 = vector.load %arg3[%c0_4, %c0_5, %c0_6] : memref<2x1x128xf32, #tpu.memory_space<vmem>>, vector<1x1x128xf32>
    %5 = vector.shape_cast %4 : vector<1x1x128xf32> to vector<1x128xf32>
    %6 = vector.broadcast %5 : vector<1x128xf32> to vector<8x128xf32>
    %7 = arith.addf %3, %6 : vector<8x128xf32>
    %cst_7 = arith.constant 0.000000e+00 : f32
    %8 = vector.broadcast %cst_7 : f32 to vector<8x128xf32>
    %9 = arith.cmpf oge, %7, %8 : vector<8x128xf32>
    %cst_8 = arith.constant 2.000000e-01 : f32
    %10 = vector.broadcast %cst_8 : f32 to vector<8x128xf32>
    %11 = arith.mulf %10, %7 : vector<8x128xf32>
    %12 = arith.select %9, %7, %11 : vector<8x128xi1>, vector<8x128xf32>
    %c1 = arith.constant 1 : index
    %c0_9 = arith.constant 0 : index
    %c0_10 = arith.constant 0 : index
    %13 = vector.load %arg2[%c1, %c0_9, %c0_10] : memref<2x128x128xf32, #tpu.memory_space<vmem>>, vector<1x128x128xf32>
    %14 = vector.shape_cast %13 : vector<1x128x128xf32> to vector<128x128xf32>
    %cst_11 = arith.constant dense<0.000000e+00> : vector<8x128xf32>
    %15 = tpu.matmul %12, %14, %cst_11 {dimension_numbers = #tpu.dot_dimension_numbers<[1], [0], [0], [1], [0, 0, 1, 1], [], []>} : vector<8x128xf32>, vector<128x128xf32>, vector<8x128xf32> -> vector<8x128xf32>
    %c1_12 = arith.constant 1 : index
    %c0_13 = arith.constant 0 : index
    %c0_14 = arith.constant 0 : index
    %16 = vector.load %arg3[%c1_12, %c0_13, %c0_14] : memref<2x1x128xf32, #tpu.memory_space<vmem>>, vector<1x1x128xf32>
    %17 = vector.shape_cast %16 : vector<1x1x128xf32> to vector<1x128xf32>
    %18 = vector.broadcast %17 : vector<1x128xf32> to vector<8x128xf32>
    %19 = arith.addf %15, %18 : vector<8x128xf32>
    %cst_15 = arith.constant 0.000000e+00 : f32
    %20 = vector.broadcast %cst_15 : f32 to vector<8x128xf32>
    %21 = arith.cmpf oge, %19, %20 : vector<8x128xf32>
    %cst_16 = arith.constant 2.000000e-01 : f32
    %22 = vector.broadcast %cst_16 : f32 to vector<8x128xf32>
    %23 = arith.mulf %22, %19 : vector<8x128xf32>
    %24 = arith.select %21, %19, %23 : vector<8x128xi1>, vector<8x128xf32>
    %c0_17 = arith.constant 0 : index
    %c0_18 = arith.constant 0 : index
    %25 = vector.load %arg4[%c0_17, %c0_18] : memref<128x384xf32, #tpu.memory_space<vmem>>, vector<128x384xf32>
    %cst_19 = arith.constant dense<0.000000e+00> : vector<8x384xf32>
    %26 = tpu.matmul %24, %25, %cst_19 {dimension_numbers = #tpu.dot_dimension_numbers<[1], [0], [0], [1], [0, 0, 1, 1], [], []>} : vector<8x128xf32>, vector<128x384xf32>, vector<8x384xf32> -> vector<8x384xf32>
    %c0_20 = arith.constant 0 : index
    %c0_21 = arith.constant 0 : index
    %27 = vector.load %arg5[%c0_20, %c0_21] : memref<1x384xf32, #tpu.memory_space<vmem>>, vector<1x384xf32>
    %28 = vector.broadcast %27 : vector<1x384xf32> to vector<8x384xf32>
    %29 = arith.addf %26, %28 : vector<8x384xf32>
    %30 = vector.extract_strided_slice %29 {offsets = [0, 0], sizes = [8, 128], strides = [1, 1]} : vector<8x384xf32> to vector<8x128xf32>
    %31 = vector.extract_strided_slice %29 {offsets = [0, 128], sizes = [8, 128], strides = [1, 1]} : vector<8x384xf32> to vector<8x128xf32>
    %32 = arith.mulf %31, %0 : vector<8x128xf32>
    %33 = arith.addf %30, %32 : vector<8x128xf32>
    %34 = vector.extract_strided_slice %29 {offsets = [0, 256], sizes = [8, 128], strides = [1, 1]} : vector<8x384xf32> to vector<8x128xf32>
    %c0_22 = arith.constant 0 : index
    %c0_23 = arith.constant 0 : index
    %c0_24 = arith.constant 0 : index
    %35 = vector.load %arg6[%c0_22, %c0_23, %c0_24] : memref<2x128x128xf32, #tpu.memory_space<vmem>>, vector<1x128x128xf32>
    %36 = vector.shape_cast %35 : vector<1x128x128xf32> to vector<128x128xf32>
    %cst_25 = arith.constant dense<0.000000e+00> : vector<8x128xf32>
    %37 = tpu.matmul %33, %36, %cst_25 {dimension_numbers = #tpu.dot_dimension_numbers<[1], [0], [0], [1], [0, 0, 1, 1], [], []>} : vector<8x128xf32>, vector<128x128xf32>, vector<8x128xf32> -> vector<8x128xf32>
    %c0_26 = arith.constant 0 : index
    %c0_27 = arith.constant 0 : index
    %c0_28 = arith.constant 0 : index
    %38 = vector.load %arg7[%c0_26, %c0_27, %c0_28] : memref<2x1x128xf32, #tpu.memory_space<vmem>>, vector<1x1x128xf32>
    %39 = vector.shape_cast %38 : vector<1x1x128xf32> to vector<1x128xf32>
    %40 = vector.broadcast %39 : vector<1x128xf32> to vector<8x128xf32>
    %41 = arith.addf %37, %40 : vector<8x128xf32>
    %cst_29 = arith.constant 0.000000e+00 : f32
    %42 = vector.broadcast %cst_29 : f32 to vector<8x128xf32>
    %43 = arith.cmpf oge, %41, %42 : vector<8x128xf32>
    %cst_30 = arith.constant 2.000000e-01 : f32
    %44 = vector.broadcast %cst_30 : f32 to vector<8x128xf32>
    %45 = arith.mulf %44, %41 : vector<8x128xf32>
    %46 = arith.select %43, %41, %45 : vector<8x128xi1>, vector<8x128xf32>
    %c1_31 = arith.constant 1 : index
    %c0_32 = arith.constant 0 : index
    %c0_33 = arith.constant 0 : index
    %47 = vector.load %arg6[%c1_31, %c0_32, %c0_33] : memref<2x128x128xf32, #tpu.memory_space<vmem>>, vector<1x128x128xf32>
    %48 = vector.shape_cast %47 : vector<1x128x128xf32> to vector<128x128xf32>
    %cst_34 = arith.constant dense<0.000000e+00> : vector<8x128xf32>
    %49 = tpu.matmul %46, %48, %cst_34 {dimension_numbers = #tpu.dot_dimension_numbers<[1], [0], [0], [1], [0, 0, 1, 1], [], []>} : vector<8x128xf32>, vector<128x128xf32>, vector<8x128xf32> -> vector<8x128xf32>
    %c1_35 = arith.constant 1 : index
    %c0_36 = arith.constant 0 : index
    %c0_37 = arith.constant 0 : index
    %50 = vector.load %arg7[%c1_35, %c0_36, %c0_37] : memref<2x1x128xf32, #tpu.memory_space<vmem>>, vector<1x1x128xf32>
    %51 = vector.shape_cast %50 : vector<1x1x128xf32> to vector<1x128xf32>
    %52 = vector.broadcast %51 : vector<1x128xf32> to vector<8x128xf32>
    %53 = arith.addf %49, %52 : vector<8x128xf32>
    %cst_38 = arith.constant 0.000000e+00 : f32
    %54 = vector.broadcast %cst_38 : f32 to vector<8x128xf32>
    %55 = arith.cmpf oge, %53, %54 : vector<8x128xf32>
    %cst_39 = arith.constant 2.000000e-01 : f32
    %56 = vector.broadcast %cst_39 : f32 to vector<8x128xf32>
    %57 = arith.mulf %56, %53 : vector<8x128xf32>
    %58 = arith.select %55, %53, %57 : vector<8x128xi1>, vector<8x128xf32>
    %c0_40 = arith.constant 0 : index
    %c0_41 = arith.constant 0 : index
    %59 = vector.load %arg8[%c0_40, %c0_41] : memref<128x256xf32, #tpu.memory_space<vmem>>, vector<128x256xf32>
    %cst_42 = arith.constant dense<0.000000e+00> : vector<8x256xf32>
    %60 = tpu.matmul %58, %59, %cst_42 {dimension_numbers = #tpu.dot_dimension_numbers<[1], [0], [0], [1], [0, 0, 1, 1], [], []>} : vector<8x128xf32>, vector<128x256xf32>, vector<8x256xf32> -> vector<8x256xf32>
    %c0_43 = arith.constant 0 : index
    %c0_44 = arith.constant 0 : index
    %61 = vector.load %arg9[%c0_43, %c0_44] : memref<1x256xf32, #tpu.memory_space<vmem>>, vector<1x256xf32>
    %62 = vector.broadcast %61 : vector<1x256xf32> to vector<8x256xf32>
    %63 = arith.addf %60, %62 : vector<8x256xf32>
    %64 = tpu.iota {dimensions = array<i32: 1>} : vector<8x256xi32>
    %65 = math.exp %63 : vector<8x256xf32>
    %cst_45 = arith.constant 9.99999974E-6 : f32
    %cst_46 = arith.constant 1.000000e+06 : f32
    %66 = vector.broadcast %cst_45 : f32 to vector<8x256xf32>
    %67 = arith.maximumf %66, %65 : vector<8x256xf32>
    %68 = vector.broadcast %cst_46 : f32 to vector<8x256xf32>
    %69 = arith.minimumf %68, %67 : vector<8x256xf32>
    %cst_47 = arith.constant 0.000000e+00 : f32
    %70 = vector.broadcast %cst_47 : f32 to vector<8x256xf32>
    %71 = arith.maximumf %63, %70 : vector<8x256xf32>
    %72 = math.absf %63 : vector<8x256xf32>
    %cst_48 = arith.constant 0.000000e+00 : f32
    %73 = vector.broadcast %cst_48 : f32 to vector<8x256xf32>
    %74 = arith.subf %73, %72 : vector<8x256xf32>
    %75 = math.exp %74 : vector<8x256xf32>
    %76 = math.log1p %75 : vector<8x256xf32>
    %77 = arith.addf %71, %76 : vector<8x256xf32>
    %cst_49 = arith.constant 9.99999974E-5 : f32
    %cst_50 = arith.constant 1.000000e+04 : f32
    %78 = vector.broadcast %cst_49 : f32 to vector<8x256xf32>
    %79 = arith.maximumf %78, %77 : vector<8x256xf32>
    %80 = vector.broadcast %cst_50 : f32 to vector<8x256xf32>
    %81 = arith.minimumf %80, %79 : vector<8x256xf32>
    %82 = arith.negf %63 : vector<8x256xf32>
    %83 = math.exp %82 : vector<8x256xf32>
    %cst_51 = arith.constant 1.000000e+00 : f32
    %84 = vector.broadcast %cst_51 : f32 to vector<8x256xf32>
    %85 = arith.addf %84, %83 : vector<8x256xf32>
    %86 = arith.divf %84, %85 : vector<8x256xf32>
    %c64_i32 = arith.constant 64 : i32
    %87 = vector.broadcast %c64_i32 : i32 to vector<8x256xi32>
    %88 = arith.cmpi slt, %64, %87 : vector<8x256xi32>
    %cst_52 = arith.constant 0.000000e+00 : f32
    %89 = vector.broadcast %cst_52 : f32 to vector<8x256xf32>
    %90 = arith.select %88, %69, %89 : vector<8x256xi1>, vector<8x256xf32>
    %c64_i32_53 = arith.constant 64 : i32
    %91 = vector.broadcast %c64_i32_53 : i32 to vector<8x256xi32>
    %92 = arith.cmpi sge, %64, %91 : vector<8x256xi32>
    %c128_i32 = arith.constant 128 : i32
    %93 = vector.broadcast %c128_i32 : i32 to vector<8x256xi32>
    %94 = arith.cmpi slt, %64, %93 : vector<8x256xi32>
    %95 = arith.andi %92, %94 : vector<8x256xi1>
    %cst_54 = arith.constant 0.000000e+00 : f32
    %96 = vector.broadcast %cst_54 : f32 to vector<8x256xf32>
    %97 = arith.select %95, %81, %96 : vector<8x256xi1>, vector<8x256xf32>
    %98 = arith.addf %90, %97 : vector<8x256xf32>
    %c128_i32_55 = arith.constant 128 : i32
    %99 = vector.broadcast %c128_i32_55 : i32 to vector<8x256xi32>
    %100 = arith.cmpi sge, %64, %99 : vector<8x256xi32>
    %c192_i32 = arith.constant 192 : i32
    %101 = vector.broadcast %c192_i32 : i32 to vector<8x256xi32>
    %102 = arith.cmpi slt, %64, %101 : vector<8x256xi32>
    %103 = arith.andi %100, %102 : vector<8x256xi1>
    %cst_56 = arith.constant 0.000000e+00 : f32
    %104 = vector.broadcast %cst_56 : f32 to vector<8x256xf32>
    %105 = arith.select %103, %86, %104 : vector<8x256xi1>, vector<8x256xf32>
    %106 = arith.addf %98, %105 : vector<8x256xf32>
    %107 = vector.extract_strided_slice %106 {offsets = [0, 0], sizes = [8, 128], strides = [1, 1]} : vector<8x256xf32> to vector<8x128xf32>
    %c0_57 = arith.constant 0 : index
    %c0_58 = arith.constant 0 : index
    %108 = vector.load %arg10[%c0_57, %c0_58] : memref<8x256xf32, #tpu.memory_space<vmem>>, vector<8x128xf32>
    tpu.vector_store %arg10[%c0_57, %c0_58], %107 {strides = array<i32>} : memref<8x256xf32, #tpu.memory_space<vmem>>, vector<8x128xf32>,
    %109 = vector.extract_strided_slice %106 {offsets = [0, 128], sizes = [8, 128], strides = [1, 1]} : vector<8x256xf32> to vector<8x128xf32>
    %110 = arith.addf %109, %34 : vector<8x128xf32>
    %c0_59 = arith.constant 0 : index
    %c128 = arith.constant 128 : index
    %111 = vector.load %arg10[%c0_59, %c128] : memref<8x256xf32, #tpu.memory_space<vmem>>, vector<8x128xf32>
    tpu.vector_store %arg10[%c0_59, %c128], %110 {strides = array<i32>} : memref<8x256xf32, #tpu.memory_space<vmem>>, vector<8x128xf32>,
    return
  }
  func.func @transform_0(%arg0: i32) -> (i32, i32) {
    %c0_i32 = arith.constant 0 : i32
    %c0_i32_0 = arith.constant 0 : i32
    return %arg0, %c0_i32 : i32, i32
  }
  func.func @transform_1(%arg0: i32) -> (i32, i32, i32) {
    %c0_i32 = arith.constant 0 : i32
    %c0_i32_0 = arith.constant 0 : i32
    %c0_i32_1 = arith.constant 0 : i32
    %c0_i32_2 = arith.constant 0 : i32
    return %c0_i32, %c0_i32_0, %c0_i32_1 : i32, i32, i32
  }
  func.func @transform_2(%arg0: i32) -> (i32, i32, i32) {
    %c0_i32 = arith.constant 0 : i32
    %c0_i32_0 = arith.constant 0 : i32
    %c0_i32_1 = arith.constant 0 : i32
    %c0_i32_2 = arith.constant 0 : i32
    return %c0_i32, %c0_i32_0, %c0_i32_1 : i32, i32, i32
  }
  func.func @transform_3(%arg0: i32) -> (i32, i32) {
    %c0_i32 = arith.constant 0 : i32
    %c0_i32_0 = arith.constant 0 : i32
    %c0_i32_1 = arith.constant 0 : i32
    return %c0_i32, %c0_i32_0 : i32, i32
  }
  func.func @transform_4(%arg0: i32) -> (i32, i32) {
    %c0_i32 = arith.constant 0 : i32
    %c0_i32_0 = arith.constant 0 : i32
    %c0_i32_1 = arith.constant 0 : i32
    return %c0_i32, %c0_i32_0 : i32, i32
  }
  func.func @transform_5(%arg0: i32) -> (i32, i32, i32) {
    %c0_i32 = arith.constant 0 : i32
    %c0_i32_0 = arith.constant 0 : i32
    %c0_i32_1 = arith.constant 0 : i32
    %c0_i32_2 = arith.constant 0 : i32
    return %c0_i32, %c0_i32_0, %c0_i32_1 : i32, i32, i32
  }
  func.func @transform_6(%arg0: i32) -> (i32, i32, i32) {
    %c0_i32 = arith.constant 0 : i32
    %c0_i32_0 = arith.constant 0 : i32
    %c0_i32_1 = arith.constant 0 : i32
    %c0_i32_2 = arith.constant 0 : i32
    return %c0_i32, %c0_i32_0, %c0_i32_1 : i32, i32, i32
  }
  func.func @transform_7(%arg0: i32) -> (i32, i32) {
    %c0_i32 = arith.constant 0 : i32
    %c0_i32_0 = arith.constant 0 : i32
    %c0_i32_1 = arith.constant 0 : i32
    return %c0_i32, %c0_i32_0 : i32, i32
  }
  func.func @transform_8(%arg0: i32) -> (i32, i32) {
    %c0_i32 = arith.constant 0 : i32
    %c0_i32_0 = arith.constant 0 : i32
    %c0_i32_1 = arith.constant 0 : i32
    return %c0_i32, %c0_i32_0 : i32, i32
  }
  func.func @transform_9(%arg0: i32) -> (i32, i32) {
    %c0_i32 = arith.constant 0 : i32
    %c0_i32_0 = arith.constant 0 : i32
    return %arg0, %c0_i32 : i32, i32
  }
}

</mosaic_0001>

<bundles_post_ra>
// kernel: forward.1
= control target key start
LH: loop header
LB: loop body
LE: loop exit
PB: predicated region body
PF: predicated region fallthrough
CT: control target
= control target key end

     0   :  { %14 = vsyncpa [#allocation3], 0  ;;  %s2259_s0 = inlined_call_operand.vmem [shape: f32[16,128], index: 0, kind: input, shape index: {}]   ;;  %s2260_s1 = inlined_call_operand.hbm [shape: f32[2,128,128], index: 1, kind: input, shape index: {}]   ;;  %s2261_s2 = inlined_call_operand.vmem [shape: f32[2,1,128], index: 2, kind: input, shape index: {}]   ;;  %s2262_s3 = inlined_call_operand.hbm [shape: f32[128,384], index: 3, kind: input, shape index: {}]   ;;  %s2263_s4 = inlined_call_operand.vmem [shape: f32[1,384], index: 4, kind: input, shape index: {}]   ;;  %s2264_s5 = inlined_call_operand.hbm [shape: f32[2,128,128], index: 5, kind: input, shape index: {}]   ;;  %s2265_s6 = inlined_call_operand.vmem [shape: f32[2,1,128], index: 6, kind: input, shape index: {}]   ;;  %s2266_s7 = inlined_call_operand.hbm [shape: f32[128,256], index: 7, kind: input, shape index: {}]   ;;  %s2267_s8 = inlined_call_operand.vmem [shape: f32[1,256], index: 8, kind: input, shape index: {}]   ;;  %s2268_s9 = inlined_call_operand.vmem [shape: f32[16,256], index: 9, kind: output, shape index: {}]  }
   0x1   :  { %15 = vsyncpa [#allocation5], 0 }
   0x2   :  { %16 = vsyncpa [#allocation8], 0  ;;  %s2015_s30 = smov 0  }
   0x3 LB: > { %s1952_s10 = smov [#allocation4]   ;;  %s2021_s12 = sadd.s32 4294967295, %s1950_s30   ;;  %s1950_s30 = sphi %s2015_s30, %s22_s30  }
   0x4   : > { %s275_s11 = sshll.u32 %s1952_s10, 4  ;;  %p1283_p0 = scmp.ge.s32.totalorder %s1950_s30, 1  ;;  %s2026_s11 = int_to_ptr.vmem [resolvable:$true] %s275_s11 }
   0x5   : > { %p247_p1 = scmp.lt.s32.totalorder %s1950_s30, 3  ;;  %p2269_p2 = scmp.eq.s32.totalorder %s2021_s12, 0 }
   0x6   : > { %s1953_s14 = smov [#allocation2]   ;;  %s1954_s17 = smov [#allocation6]  }
   0x7   : > { %p2028_p3 = pnand %p1283_p0, %p247_p1  ;;  %s259_s15 = sshll.u32 %s1953_s14, 4  ;;  %s2034_s15 = int_to_ptr.vmem [resolvable:$true] %s259_s15 }
   0x8   : > { %s2042_s18 = sshll.u32 %s1954_s17, 4  ;;  %s1820_s21 = scalar_lea.hbm %s2262_s3, 6144  ;;  %s292_s18 = int_to_ptr.vmem [resolvable:$true] %s2042_s18 }
   0x9   : > { %s2271_s13 = scalar_select %p2028_p3, 1, 0 }
   0xa   : > { %p1768_p4 = pneg %p2028_p3  ;;  %p1821_p6 = scmp.ne.s32.totalorder %s2262_s3, %s1820_s21 }
   0xb   : > { %p1827_p10 = scmp.lt.u32.totalorder %s1820_s21, %s2262_s3 }
   0xc   : > { %p2038_p5 = pnand %p2269_p2, %p1768_p4 }
   0xe   : > { %p2052_p7 = pneg %p2038_p5 }
  0x10   : > { %p1823_p8 = pnand %p2052_p7, %p1821_p6 }
  0x12   : > { %p1824_p9 = pneg %p1823_p8 }
  0x14   : > { %p1829_p11 = pnand %p1827_p10, %p1824_p9 }
  0x16   : > { %1832 = shalt.err (!%p1829_p11)
}
  0x17   : > { %s1833_s27 = scalar_lea.vmem %s2026_s11, 6144  ;;  %p1841_p1 = scmp.lt.s32.totalorder %s2026_s11, %s2026_s11 }
  0x18   : > { %p1834_p12 = scmp.ne.s32.totalorder %s2026_s11, %s1833_s27  ;;  %p1842_p4 = scmp.lt.s32.totalorder %s1833_s27, %s1833_s27 }
  0x1a   : > { %p1836_p13 = pnand %p1834_p12, %p2052_p7  ;;  %p1843_p6 = por %p1842_p4, %p1841_p1 }
  0x1c   : > { %p1837_p0 = pneg %p1836_p13 }
  0x1e   : > { %p1844_p8 = pnand %p1843_p6, %p1837_p0 }
  0x20   : > { %1847 = shalt.err (!%p1844_p8)
}
  0x21   : > { %s1955_s28 = smov 384   ;;  %s1956_s29 = smov 24  }
  0x22   : > { %1774 = dma.hbm_to_vmem [thread:$0]  (!%p2038_p5), %s2262_s3, 6144, %s2026_s11, [#allocation5], %s1955_s28, %s1955_s28, %s1956_s29  }
  0x23   : > { %s1848_s20 = scalar_lea.hbm %s2260_s1, 4096 }
  0x24   : > { %p1849_p9 = scmp.ne.s32.totalorder %s2260_s1, %s1848_s20  ;;  %p1855_p12 = scmp.lt.u32.totalorder %s1848_s20, %s2260_s1 }
  0x26   : > { %p1851_p10 = pnand %p1849_p9, %p2052_p7 }
  0x28   : > { %p1852_p11 = pneg %p1851_p10 }
  0x2a   : > { %p1857_p13 = pnand %p1855_p12, %p1852_p11 }
  0x2c   : > { %1860 = shalt.err (!%p1857_p13)
}
  0x2d   : > { %s1861_s11 = scalar_lea.vmem %s2034_s15, 4096  ;;  %p1869_p6 = scmp.lt.s32.totalorder %s2034_s15, %s2034_s15 }
  0x2e   : > { %p1862_p0 = scmp.ne.s32.totalorder %s2034_s15, %s1861_s11  ;;  %p1870_p8 = scmp.lt.s32.totalorder %s1861_s11, %s1861_s11 }
  0x30   : > { %p1864_p1 = pnand %p1862_p0, %p2052_p7  ;;  %p1871_p9 = por %p1870_p8, %p1869_p6 }
  0x32   : > { %p1865_p4 = pneg %p1864_p1 }
  0x34   : > { %p1872_p10 = pnand %p1871_p9, %p1865_p4 }
  0x36   : > { %1875 = shalt.err (!%p1872_p10)
}
  0x37   : > { %s1957_s26 = smov 128   ;;  %s1958_s27 = smov 8  }
  0x38   : > { %1771 = dma.hbm_to_vmem [thread:$0]  (!%p2038_p5), %s2260_s1, 4096, %s2034_s15, [#allocation3], %s1957_s26, %s1957_s26, %s1958_s27  }
  0x39   : > { %s1959_s10 = smov [#allocation7]   ;;  %s1876_s20 = scalar_lea.hbm %s2264_s5, 4096 }
  0x3a   : > { %s307_s14 = sshll.u32 %s1959_s10, 4  ;;  %p1877_p11 = scmp.ne.s32.totalorder %s2264_s5, %s1876_s20  ;;  %s308_s14 = int_to_ptr.vmem [resolvable:$true] %s307_s14 }
  0x3b   : > { %p1883_p0 = scmp.lt.u32.totalorder %s1876_s20, %s2264_s5 }
  0x3c   : > { %p1879_p12 = pnand %p1877_p11, %p2052_p7 }
  0x3e   : > { %p1880_p13 = pneg %p1879_p12 }
  0x40   : > { %p1885_p1 = pnand %p1883_p0, %p1880_p13 }
  0x42   : > { %1888 = shalt.err (!%p1885_p1)
}
  0x43   : > { %s1889_s15 = scalar_lea.vmem %s292_s18, 4096  ;;  %p1897_p9 = scmp.lt.s32.totalorder %s292_s18, %s292_s18 }
  0x44   : > { %p1890_p4 = scmp.ne.s32.totalorder %s292_s18, %s1889_s15  ;;  %p1898_p10 = scmp.lt.s32.totalorder %s1889_s15, %s1889_s15 }
  0x46   : > { %p1892_p6 = pnand %p1890_p4, %p2052_p7  ;;  %p1899_p2 = por %p1898_p10, %p1897_p9 }
  0x48   : > { %p1893_p8 = pneg %p1892_p6 }
  0x4a   : > { %p1900_p3 = pnand %p1899_p2, %p1893_p8 }
  0x4c   : > { %1903 = shalt.err (!%p1900_p3)
}
  0x4d   : > { %1777 = dma.hbm_to_vmem [thread:$0]  (!%p2038_p5), %s2264_s5, 4096, %s292_s18, [#allocation5], %s1957_s26, %s1957_s26, %s1958_s27  }
  0x4e   : > { %s1904_s17 = scalar_lea.hbm %s2266_s7, 4096 }
  0x4f   : > { %p1905_p11 = scmp.ne.s32.totalorder %s2266_s7, %s1904_s17  ;;  %p1911_p3 = scmp.lt.u32.totalorder %s1904_s17, %s2266_s7 }
  0x51   : > { %p1907_p12 = pnand %p1905_p11, %p2052_p7 }
  0x53   : > { %p1908_p2 = pneg %p1907_p12 }
  0x55   : > { %p1913_p13 = pnand %p1911_p3, %p1908_p2 }
  0x57   : > { %1916 = shalt.err (!%p1913_p13)
}
  0x58   : > { %s1917_s23 = scalar_lea.vmem %s308_s14, 4096  ;;  %p1925_p6 = scmp.lt.s32.totalorder %s308_s14, %s308_s14 }
  0x59   : > { %p1918_p0 = scmp.ne.s32.totalorder %s308_s14, %s1917_s23  ;;  %p1926_p8 = scmp.lt.s32.totalorder %s1917_s23, %s1917_s23 }
  0x5b   : > { %p1920_p1 = pnand %p1918_p0, %p2052_p7  ;;  %p1927_p9 = por %p1926_p8, %p1925_p6 }
  0x5d   : > { %p1921_p4 = pneg %p1920_p1 }
  0x5f   : > { %p1928_p10 = pnand %p1927_p9, %p1921_p4 }
  0x61   : > { %1931 = shalt.err (!%p1928_p10)
}
  0x62   : > { %s1960_s18 = smov 256   ;;  %s1961_s26 = smov 16  }
  0x63   : > { %1780 = dma.hbm_to_vmem [thread:$0]  (!%p2038_p5), %s2266_s7, 4096, %s308_s14, [#allocation8], %s1960_s18, %s1960_s18, %s1961_s26  }
  0x64   : > { %p2274_p11 = scmp.ne.s32.totalorder %s2271_s13, 0 }
  0x65   : > { %p2275_p12 = scmp.eq.s32.totalorder (!%p2274_p11), %s2021_s12, 0 }
  0x66   : > { %333 = sbr.rel (%p2274_p11) target bundleno = 1495 (0x5d7), region = 56 }
  0x6d   : > { %1937 = dma.done.wait (%p2275_p12), [#allocation3], 4096   ;;  %p2276_p7 = pmov %p2275_p12 }
  0x6f   : > { %1939 = vsyncadd (%p2276_p7), [#allocation3], 4294963200  ;;  %p2277_p2 = pmov %p2276_p7 }
  0x71   : > { %1941 = dma.done.wait (%p2277_p2), [#allocation5], 10240   ;;  %p2278_p3 = pmov %p2277_p2 }
  0x72   : > { %p2279_p13 = pmov %p2277_p2 }
  0x73   : > { %1943 = vsyncadd (%p2278_p3), [#allocation5], 4294957056 }
  0x74   : > { %1945 = dma.done.wait (%p2279_p13), [#allocation8], 4096   ;;  %p2280_p5 = pmov %p2277_p2 }
  0x75   : > { %v1962_v0 = vmov 0.0|0.0   ;;  %vm1963_vm0 = vmmov 0   ;;  %v1964_v1 = vmov 0.0   ;;  %v390_v2 = vld [vmem:[#allocation2] sm:$0xff]  ;;  %v391_v3 = vld [vmem:[#allocation2 + $0x8] sm:$0xff]  ;;  %v392_v4 = vld [vmem:[#allocation2 + $0x10] sm:$0xff] }
  0x76   : > { %1947 = vsyncadd (%p2280_p5), [#allocation8], 4294963200  ;;  %1568 = vmatprep.subr.bf16.mxu0 %v1962_v0  ;;  %1425 = vmatprep.mubr.msk.f32.mxu0 %vm1963_vm0, %v1964_v1  ;;  %v1569_v5 = vpack.c.bf16 %v391_v3, %v390_v2  ;;  %v393_v6 = vld [vmem:[#allocation2 + $0x18] sm:$0xff]  ;;  %v394_v8 = vld [vmem:[#allocation2 + $0x20] sm:$0xff]  ;;  %p380_p0 = scmp.lt.s32.totalorder %s2021_s12, 1 }
  0x77   : > { %1592 = vmatprep.subr.bf16.mxu1 %v1962_v0  ;;  %1460 = vmatprep.mubr.msk.f32.mxu1 %vm1963_vm0, %v1964_v1  ;;  %v1572_v7 = vpack.c.bf16 %v393_v6, %v392_v4  ;;  %v395_v9 = vld [vmem:[#allocation2 + $0x28] sm:$0xff]  ;;  %v487_v10 = vld [vmem:[#allocation2 + $0x80] sm:$0xff]  ;;  %v489_v12 = vld [vmem:[#allocation2 + $0x90] sm:$0xff] }
  0x78   : > { %1570 = vmatpush3.bf16.msra.mxu0 %v1569_v5  ;;  %v488_v11 = vld [vmem:[#allocation2 + $0x88] sm:$0xff]  ;;  %v490_v13 = vld [vmem:[#allocation2 + $0x98] sm:$0xff]  ;;  %v1575_v14 = vpack.c.bf16 %v395_v9, %v394_v8  ;;  %v396_v16 = vld [vmem:[#allocation2 + $0x30] sm:$0xff]  ;;  %s2282_s12 = smov (!%p380_p0, %s2021_s12), 1 }
  0x79   : > { %1571 = vmatprep.subr.bf16.mxu0 %v1962_v0  ;;  %v1593_v15 = vpack.c.bf16 %v488_v11, %v487_v10  ;;  %v397_v17 = vld [vmem:[#allocation2 + $0x38] sm:$0xff]  ;;  %v1596_v18 = vpack.c.bf16 %v490_v13, %v489_v12  ;;  %v491_v19 = vld [vmem:[#allocation2 + $0xa0] sm:$0xff]  ;;  %v492_v20 = vld [vmem:[#allocation2 + $0xa8] sm:$0xff]  ;;  %s1294_s13 = sshll.u32 %s2282_s12, 3  ;;  %s1307_s26 = sshll.u32 %s2282_s12, 4 }
  0x7a   : > { %v1578_v21 = vpack.c.bf16 %v397_v17, %v396_v16  ;;  %v398_v22 = vld [vmem:[#allocation2 + $0x40] sm:$0xff]  ;;  %v399_v23 = vld [vmem:[#allocation2 + $0x48] sm:$0xff]  ;;  %v1599_v24 = vpack.c.bf16 %v492_v20, %v491_v19  ;;  %v493_v25 = vld [vmem:[#allocation2 + $0xb0] sm:$0xff]  ;;  %s383_s14 = scalar_lea.vmem %s2259_s0, %s1294_s13  ;;  %s388_s13 = scalar_lea.vmem %s2268_s9, %s1307_s26 }
  0x7b   : > { %1594 = vmatpush3.bf16.msra.mxu1 %v1593_v15  ;;  %v494_v26 = vld [vmem:[#allocation2 + $0xb8] sm:$0xff]  ;;  %v1581_v27 = vpack.c.bf16 %v399_v23, %v398_v22  ;;  %v400_v28 = vld [vmem:[#allocation2 + $0x50] sm:$0xff]  ;;  %v495_v31 = vld [vmem:[#allocation2 + $0xc0] sm:$0xff] }
  0x7c   : > { %1573 = vmatpush3.bf16.msra.mxu0 %v1572_v7  ;;  %1595 = vmatprep.subr.bf16.mxu1 %v1962_v0  ;;  %v401_v29 = vld [vmem:[#allocation2 + $0x58] sm:$0xff]  ;;  %v1602_v30 = vpack.c.bf16 %v494_v26, %v493_v25  ;;  %v496_v32 = vld [vmem:[#allocation2 + $0xc8] sm:$0xff]  ;;  %v402_v34 = vld [vmem:[#allocation2 + $0x60] sm:$0xff] }
  0x7d   : > { %1574 = vmatprep.subr.bf16.mxu0 %v1962_v0  ;;  %v1584_v33 = vpack.c.bf16 %v401_v29, %v400_v28  ;;  %v403_v35 = vld [vmem:[#allocation2 + $0x68] sm:$0xff]  ;;  %v1605_v36 = vpack.c.bf16 %v496_v32, %v495_v31  ;;  %v497_v37 = vld [vmem:[#allocation2 + $0xd0] sm:$0xff]  ;;  %v498_v38 = vld [vmem:[#allocation2 + $0xd8] sm:$0xff] }
  0x7e   : > { %v1587_v39 = vpack.c.bf16 %v403_v35, %v402_v34  ;;  %v404_v40 = vld [vmem:[#allocation2 + $0x70] sm:$0xff]  ;;  %v405_v41 = vld [vmem:[#allocation2 + $0x78] sm:$0xff]  ;;  %v1608_v42 = vpack.c.bf16 %v498_v38, %v497_v37  ;;  %v499_v43 = vld [vmem:[#allocation2 + $0xe0] sm:$0xff] }
  0x7f   : > { %1597 = vmatpush3.bf16.msra.mxu1 %v1596_v18  ;;  %v500_v44 = vld [vmem:[#allocation2 + $0xe8] sm:$0xff]  ;;  %v1590_v45 = vpack.c.bf16 %v405_v41, %v404_v40  ;;  %v2174_v47 = vld [vmem:[%s383_s14] sm:$0xff]  ;;  %v501_v48 = vld [vmem:[#allocation2 + $0xf0] sm:$0xff] }
  0x80   : > { %1576 = vmatpush3.bf16.msra.mxu0 %v1575_v14  ;;  %1598 = vmatprep.subr.bf16.mxu1 %v1962_v0  ;;  %v1611_v46 = vpack.c.bf16 %v500_v44, %v499_v43  ;;  %v502_v49 = vld [vmem:[#allocation2 + $0xf8] sm:$0xff]  ;;  %v585_v51 = vld [vmem:[#allocation4 + $0x8] sm:$0xff]  ;;  %v588_v52 = vld [vmem:[#allocation4 + $0x20] sm:$0xff] }
  0x81   : > { %1577 = vmatprep.subr.bf16.mxu0 %v1962_v0  ;;  %v1614_v50 = vpack.c.bf16 %v502_v49, %v501_v48  ;;  %v584_v53 = vld [vmem:[#allocation4] sm:$0xff]  ;;  %v1616_v54 = vpack.c.bf16 %v588_v52, %v585_v51  ;;  %v587_v55 = vld [vmem:[#allocation4 + $0x18] sm:$0xff]  ;;  %v594_v58 = vld [vmem:[#allocation4 + $0x50] sm:$0xff] }
  0x82   : > { %v1618_v56 = vpack.c.bf16 %v587_v55, %v584_v53  ;;  %v591_v57 = vld [vmem:[#allocation4 + $0x38] sm:$0xff]  ;;  %v590_v59 = vld [vmem:[#allocation4 + $0x30] sm:$0xff]  ;;  %v593_v61 = vld [vmem:[#allocation4 + $0x48] sm:$0xff] }
  0x83   : > { %1600 = vmatpush3.bf16.msra.mxu1 %v1599_v24  ;;  %v1620_v60 = vpack.c.bf16 %v594_v58, %v591_v57  ;;  %v1622_v62 = vpack.c.bf16 %v593_v61, %v590_v59  ;;  %v597_v63 = vld [vmem:[#allocation4 + $0x68] sm:$0xff]  ;;  %v600_v2 = vld [vmem:[#allocation4 + $0x80] sm:$0xff]  ;;  %v599_v5 = vld [vmem:[#allocation4 + $0x78] sm:$0xff] }
  0x84   : > { %1579 = vmatpush3.bf16.msra.mxu0 %v1578_v21  ;;  %1601 = vmatprep.subr.bf16.mxu1 %v1962_v0  ;;  %v1624_v3 = vpack.c.bf16 %v600_v2, %v597_v63  ;;  %v596_v4 = vld [vmem:[#allocation4 + $0x60] sm:$0xff]  ;;  %v603_v7 = vld [vmem:[#allocation4 + $0x98] sm:$0xff]  ;;  %v606_v8 = vld [vmem:[#allocation4 + $0xb0] sm:$0xff] }
  0x85   : > { %1580 = vmatprep.subr.bf16.mxu0 %v1962_v0  ;;  %v1626_v6 = vpack.c.bf16 %v599_v5, %v596_v4  ;;  %v1628_v9 = vpack.c.bf16 %v606_v8, %v603_v7  ;;  %v602_v10 = vld [vmem:[#allocation4 + $0x90] sm:$0xff]  ;;  %v605_v11 = vld [vmem:[#allocation4 + $0xa8] sm:$0xff]  ;;  %v612_v14 = vld [vmem:[#allocation4 + $0xe0] sm:$0xff] }
  0x86   : > { %v1630_v12 = vpack.c.bf16 %v605_v11, %v602_v10  ;;  %v609_v13 = vld [vmem:[#allocation4 + $0xc8] sm:$0xff]  ;;  %v608_v16 = vld [vmem:[#allocation4 + $0xc0] sm:$0xff]  ;;  %v611_v17 = vld [vmem:[#allocation4 + $0xd8] sm:$0xff] }
  0x87   : > { %1603 = vmatpush3.bf16.msra.mxu1 %v1602_v30  ;;  %v1632_v15 = vpack.c.bf16 %v612_v14, %v609_v13  ;;  %v1634_v18 = vpack.c.bf16 %v611_v17, %v608_v16  ;;  %v615_v19 = vld [vmem:[#allocation4 + $0xf8] sm:$0xff]  ;;  %v618_v20 = vld [vmem:[#allocation4 + $0x110] sm:$0xff]  ;;  %v617_v23 = vld [vmem:[#allocation4 + $0x108] sm:$0xff] }
  0x88   : > { %1582 = vmatpush3.bf16.msra.mxu0 %v1581_v27  ;;  %1604 = vmatprep.subr.bf16.mxu1 %v1962_v0  ;;  %v1636_v21 = vpack.c.bf16 %v618_v20, %v615_v19  ;;  %v614_v22 = vld [vmem:[#allocation4 + $0xf0] sm:$0xff]  ;;  %v621_v25 = vld [vmem:[#allocation4 + $0x128] sm:$0xff]  ;;  %v624_v26 = vld [vmem:[#allocation4 + $0x140] sm:$0xff] }
  0x89   : > { %1583 = vmatprep.subr.bf16.mxu0 %v1962_v0  ;;  %v1638_v24 = vpack.c.bf16 %v617_v23, %v614_v22  ;;  %v1640_v27 = vpack.c.bf16 %v624_v26, %v621_v25  ;;  %v620_v28 = vld [vmem:[#allocation4 + $0x120] sm:$0xff]  ;;  %v623_v29 = vld [vmem:[#allocation4 + $0x138] sm:$0xff]  ;;  %v589_v34 = vld [vmem:[#allocation4 + $0x28] sm:$0xff] }
  0x8a   : > { %v1642_v30 = vpack.c.bf16 %v623_v29, %v620_v28  ;;  %v1297_v31 = vld [vmem:[%s2261_s2] ss:$0 sm:$0xff]  ;;  %v595_v40 = vld [vmem:[#allocation4 + $0x58] sm:$0xff]  ;;  %v598_v43 = vld [vmem:[#allocation4 + $0x70] sm:$0xff] }
  0x8b   : > { %1606 = vmatpush3.bf16.msra.mxu1 %v1605_v36  ;;  %v601_v44 = vld [vmem:[#allocation4 + $0x88] sm:$0xff]  ;;  %v607_v48 = vld [vmem:[#allocation4 + $0xb8] sm:$0xff]  ;;  %v616_v53 = vld [vmem:[#allocation4 + $0x100] sm:$0xff] }
  0x8c   : > { %1585 = vmatpush3.bf16.msra.mxu0 %v1584_v33  ;;  %1607 = vmatprep.subr.bf16.mxu1 %v1962_v0  ;;  %v586_v33 = vld [vmem:[#allocation4 + $0x10] sm:$0xff]  ;;  %v613_v51 = vld [vmem:[#allocation4 + $0xe8] sm:$0xff]  ;;  %v627_v59 = vld [vmem:[#allocation4 + $0x158] sm:$0xff] }
  0x8d   : > { %1586 = vmatprep.subr.bf16.mxu0 %v1962_v0  ;;  %v1649_v38 = vpack.c.bf16 %v589_v34, %v586_v33  ;;  %v625_v57 = vld [vmem:[#allocation4 + $0x148] sm:$0xff]  ;;  %v628_v2 = vld [vmem:[#allocation4 + $0x160] sm:$0xff]  ;;  %v631_v4 = vld [vmem:[#allocation4 + $0x178] sm:$0xff] }
  0x8e   : > { %v629_v63 = vld [vmem:[#allocation4 + $0x168] sm:$0xff]  ;;  %v1670_v5 = vpack.c.bf16 %v631_v4, %v628_v2  ;;  %v792_v8 = vld [vmem:[#allocation6] sm:$0xff]  ;;  %v794_v14 = vld [vmem:[#allocation6 + $0x10] sm:$0xff] }
  0x8f   : > { %1609 = vmatpush3.bf16.msra.mxu1 %v1608_v42  ;;  %v797_v19 = vld [vmem:[#allocation6 + $0x28] sm:$0xff]  ;;  %v799_v22 = vld [vmem:[#allocation6 + $0x38] sm:$0xff]  ;;  %v806_v33 = vld [vmem:[#allocation6 + $0x70] sm:$0xff] }
  0x90   : > { %1588 = vmatpush3.bf16.msra.mxu0 %v1587_v39  ;;  %1610 = vmatprep.subr.bf16.mxu1 %v1962_v0  ;;  %v592_v39 = vld [vmem:[#allocation4 + $0x40] sm:$0xff]  ;;  %v801_v25 = vld [vmem:[#allocation6 + $0x48] sm:$0xff]  ;;  %v803_v28 = vld [vmem:[#allocation6 + $0x58] sm:$0xff] }
  0x91   : > { %1589 = vmatprep.subr.bf16.mxu0 %v1962_v0  ;;  %v1652_v42 = vpack.c.bf16 %v595_v40, %v592_v39  ;;  %v807_v34 = vld [vmem:[#allocation6 + $0x78] sm:$0xff] }
  0x92   : > { %v892_v40 = vld [vmem:[#allocation6 + $0x98] sm:$0xff] }
  0x93   : > { %1612 = vmatpush3.bf16.msra.mxu1 %v1611_v46  ;;  %v604_v46 = vld [vmem:[#allocation4 + $0xa0] sm:$0xff] }
  0x94   : > { %1591 = vmatpush3.bf16.msra.mxu0 %v1590_v45  ;;  %1613 = vmatprep.subr.bf16.mxu1 %v1962_v0  ;;  %v1655_v45 = vpack.c.bf16 %v601_v44, %v598_v43  ;;  %v1658_v49 = vpack.c.bf16 %v607_v48, %v604_v46  ;;  %v894_v43 = vld [vmem:[#allocation6 + $0xa8] sm:$0xff]  ;;  %v896_v46 = vld [vmem:[#allocation6 + $0xb8] sm:$0xff] }
  0x95   : > { %1617 = vmatprep.subr.bf16.mxu0 %v1616_v54  ;;  %v619_v54 = vld [vmem:[#allocation4 + $0x118] sm:$0xff] }
  0x96   : > { %v1664_v55 = vpack.c.bf16 %v619_v54, %v616_v53  ;;  %v900_v53 = vld [vmem:[#allocation6 + $0xd8] sm:$0xff] }
  0x97   : > { %1426 = vmatmul.mubr.f32.vlgmr.msra.gmra.mrb[0].mxu0 %v2174_v47  ;;  %1615 = vmatpush3.bf16.msra.mxu1 %v1614_v50  ;;  %v610_v50 = vld [vmem:[#allocation4 + $0xd0] sm:$0xff] }
  0x98   : > { %713 = vmatprep.mubr.f32.mxu0 %v1964_v1  ;;  %1648 = vmatprep.subr.bf16.mxu1 %v1962_v0  ;;  %v1661_v52 = vpack.c.bf16 %v613_v51, %v610_v50  ;;  %v898_v50 = vld [vmem:[#allocation6 + $0xc8] sm:$0xff] }
  0x99   : > { %1619 = vmatpush1.bf16.msra.mxu0 %v1618_v56  ;;  %v622_v56 = vld [vmem:[#allocation4 + $0x130] sm:$0xff] }
  0x9a   : > { %1621 = vmatprep.subr.bf16.mxu0 %v1620_v60  ;;  %v1667_v58 = vpack.c.bf16 %v625_v57, %v622_v56  ;;  %v630_v60 = vld [vmem:[#allocation4 + $0x170] sm:$0xff]  ;;  %v902_v56 = vld [vmem:[#allocation6 + $0xe8] sm:$0xff] }
  0x9b   : > { %v1644_v61 = vpack.c.bf16 %v630_v60, %v627_v59 }
  0x9d   : > { %1623 = vmatpush1.bf16.msra.mxu0 %v1622_v62  ;;  %v626_v62 = vld [vmem:[#allocation4 + $0x150] sm:$0xff] }
  0x9e   : > { %1625 = vmatprep.subr.bf16.mxu0 %v1624_v3  ;;  %v1646_v3 = vpack.c.bf16 %v629_v63, %v626_v62 }
  0xa1   : > { %1627 = vmatpush1.bf16.msra.mxu0 %v1626_v6  ;;  %v1299_v6 = vld [vmem:[%s2261_s2 + $0x1] ss:$0 sm:$0xff] }
  0xa2   : > { %1629 = vmatprep.subr.bf16.mxu0 %v1628_v9  ;;  %v793_v9 = vld [vmem:[#allocation6 + $0x8] sm:$0xff] }
  0xa3   : > { %v1673_v13 = vpack.c.bf16 %v793_v9, %v792_v8 }
  0xa5   : > { %1631 = vmatpush1.bf16.msra.mxu0 %v1630_v12 }
  0xa6   : > { %1633 = vmatprep.subr.bf16.mxu0 %v1632_v15  ;;  %v795_v15 = vld [vmem:[#allocation6 + $0x18] sm:$0xff] }
  0xa7   : > { %v1676_v17 = vpack.c.bf16 %v795_v15, %v794_v14  ;;  %v989_v14 = vld [vmem:[#allocation7 + $0x18] sm:$0xff]  ;;  %v986_v15 = vld [vmem:[#allocation7] sm:$0xff] }
  0xa9   : > { %1635 = vmatpush1.bf16.msra.mxu0 %v1634_v18  ;;  %v796_v18 = vld [vmem:[#allocation6 + $0x20] sm:$0xff] }
  0xaa   : > { %1637 = vmatprep.subr.bf16.mxu0 %v1636_v21  ;;  %v1679_v20 = vpack.c.bf16 %v797_v19, %v796_v18  ;;  %v798_v21 = vld [vmem:[#allocation6 + $0x30] sm:$0xff]  ;;  %v991_v18 = vld [vmem:[#allocation7 + $0x28] sm:$0xff]  ;;  %v993_v19 = vld [vmem:[#allocation7 + $0x38] sm:$0xff] }
  0xab   : > { %v1682_v23 = vpack.c.bf16 %v799_v22, %v798_v21  ;;  %v1724_v21 = vpack.c.bf16 %v993_v19, %v991_v18  ;;  %v990_v22 = vld [vmem:[#allocation7 + $0x20] sm:$0xff] }
  0xad   : > { %1639 = vmatpush1.bf16.msra.mxu0 %v1638_v24  ;;  %v800_v24 = vld [vmem:[#allocation6 + $0x40] sm:$0xff] }
  0xae   : > { %1641 = vmatprep.subr.bf16.mxu0 %v1640_v27  ;;  %v1685_v26 = vpack.c.bf16 %v801_v25, %v800_v24  ;;  %v802_v27 = vld [vmem:[#allocation6 + $0x50] sm:$0xff]  ;;  %v997_v24 = vld [vmem:[#allocation7 + $0x58] sm:$0xff] }
  0xaf   : > { %v1688_v29 = vpack.c.bf16 %v803_v28, %v802_v27  ;;  %v996_v27 = vld [vmem:[#allocation7 + $0x50] sm:$0xff]  ;;  %v999_v28 = vld [vmem:[#allocation7 + $0x68] sm:$0xff] }
  0xb1   : > { %1643 = vmatpush1.bf16.msra.mxu0 %v1642_v30  ;;  %v804_v30 = vld [vmem:[#allocation6 + $0x60] sm:$0xff] }
  0xb2   : > { %1645 = vmatprep.subr.bf16.mxu0 %v1644_v61  ;;  %v2222_v61 = vld [vmem:[%s2263_s4] sm:$0x7] }
  0xb5   : > { %1647 = vmatpush1.bf16.msra.mxu0 %v1646_v3 }
  0xb6   : > { %1672 = vmatprep.subr.bf16.mxu0 %v1962_v0 }
 0x16a   : > { %v479_v32 = vpop.f32.mrb[0].mxu0 }
 0x16b   : > { %v480_v35 = vadd.f32 %v1297_v31, %v479_v32  ;;  %v1427_v36 = vpop.f32.mrb[1].mxu0  ;;  %v805_v31 = vld [vmem:[#allocation6 + $0x68] sm:$0xff] }
 0x16c   : > { %v1691_v32 = vpack.c.bf16 %v805_v31, %v804_v30  ;;  %v889_v36 = vld [vmem:[#allocation6 + $0x80] sm:$0xff] }
 0x16d   : > { %v484_v37 = vmul.f32 0.2, %v480_v35  ;;  %vm483_vm1 = vcmp.ge.f32.partialorder %v480_v35, 0.0 }
 0x16f   : > { %v485_v41 = vsel %vm483_vm1, %v480_v35, %v484_v37  ;;  %v1694_v35 = vpack.c.bf16 %v807_v34, %v806_v33  ;;  %v890_v37 = vld [vmem:[#allocation6 + $0x88] sm:$0xff]  ;;  %v1000_v33 = vld [vmem:[#allocation7 + $0x70] sm:$0xff] }
 0x170   : > { %1461 = vmatmul.mubr.f32.vlgmr.msra.gmra.mrb[0].mxu1 %v485_v41  ;;  %v1697_v39 = vpack.c.bf16 %v890_v37, %v889_v36  ;;  %v1003_v34 = vld [vmem:[#allocation7 + $0x88] sm:$0xff] }
 0x171   : > { %1650 = vmatpush3.bf16.msra.mxu1 %v1649_v38  ;;  %1495 = vmatprep.mubr.msk.f32.mxu1 %vm1963_vm0, %v1964_v1  ;;  %v891_v38 = vld [vmem:[#allocation6 + $0x90] sm:$0xff] }
 0x172   : > { %1651 = vmatprep.subr.bf16.mxu1 %v1962_v0  ;;  %v1700_v41 = vpack.c.bf16 %v892_v40, %v891_v38  ;;  %v1002_v38 = vld [vmem:[#allocation7 + $0x80] sm:$0xff]  ;;  %v1007_v40 = vld [vmem:[#allocation7 + $0xa8] sm:$0xff] }
 0x175   : > { %1653 = vmatpush3.bf16.msra.mxu1 %v1652_v42  ;;  %v893_v42 = vld [vmem:[#allocation6 + $0xa0] sm:$0xff] }
 0x176   : > { %1654 = vmatprep.subr.bf16.mxu1 %v1962_v0  ;;  %v1703_v44 = vpack.c.bf16 %v894_v43, %v893_v42 }
 0x179   : > { %1656 = vmatpush3.bf16.msra.mxu1 %v1655_v45  ;;  %v895_v45 = vld [vmem:[#allocation6 + $0xb0] sm:$0xff] }
 0x17a   : > { %1657 = vmatprep.subr.bf16.mxu1 %v1962_v0  ;;  %v1706_v48 = vpack.c.bf16 %v896_v46, %v895_v45  ;;  %v1008_v45 = vld [vmem:[#allocation7 + $0xb0] sm:$0xff]  ;;  %v1011_v46 = vld [vmem:[#allocation7 + $0xc8] sm:$0xff] }
 0x17d   : > { %1659 = vmatpush3.bf16.msra.mxu1 %v1658_v49  ;;  %v897_v49 = vld [vmem:[#allocation6 + $0xc0] sm:$0xff] }
 0x17e   : > { %1660 = vmatprep.subr.bf16.mxu1 %v1962_v0  ;;  %v1709_v51 = vpack.c.bf16 %v898_v50, %v897_v49 }
 0x181   : > { %1662 = vmatpush3.bf16.msra.mxu1 %v1661_v52  ;;  %v899_v52 = vld [vmem:[#allocation6 + $0xd0] sm:$0xff] }
 0x182   : > { %1663 = vmatprep.subr.bf16.mxu1 %v1962_v0  ;;  %v1712_v54 = vpack.c.bf16 %v900_v53, %v899_v52  ;;  %v1012_v52 = vld [vmem:[#allocation7 + $0xd0] sm:$0xff] }
 0x185   : > { %1665 = vmatpush3.bf16.msra.mxu1 %v1664_v55  ;;  %v901_v55 = vld [vmem:[#allocation6 + $0xe0] sm:$0xff] }
 0x186   : > { %1666 = vmatprep.subr.bf16.mxu1 %v1962_v0  ;;  %v1715_v57 = vpack.c.bf16 %v902_v56, %v901_v55 }
 0x189   : > { %1668 = vmatpush3.bf16.msra.mxu1 %v1667_v58  ;;  %v634_v58 = vlaneseq }
 0x18a   : > { %1669 = vmatprep.subr.bf16.mxu1 %v1962_v0 }
 0x18b   : > { %v2216_v59 = vshrl.u32 %v634_v58, 7 }
 0x18d   : > { %1671 = vmatpush3.bf16.msra.mxu1 %v1670_v5  ;;  %v640_v60 = vsub.s32 1, %v2216_v59  ;;  %v636_v62 = vsub.s32 0, %v2216_v59 }
 0x18e   : > { %1696 = vmatprep.subr.bf16.mxu1 %v1962_v0 }
 0x18f   : > { %v641_v63 = vrot.slane %v2222_v61, %v640_v60 }
 0x243   : > { %v577_v7 = vpop.f32.mrb[0].mxu1 }
 0x244   : > { %v578_v10 = vadd.f32 %v1299_v6, %v577_v7  ;;  %v1462_v11 = vpop.f32.mrb[1].mxu1 }
 0x245   : > { %v904_v11 = vld [vmem:[#allocation6 + $0xf8] sm:$0xff] }
 0x246   : > { %vm581_vm2 = vcmp.ge.f32.partialorder %v578_v10, 0.0  ;;  %v582_v12 = vmul.f32 0.2, %v578_v10 }
 0x248   : > { %v583_v16 = vsel %vm581_vm2, %v578_v10, %v582_v12  ;;  %v903_v10 = vld [vmem:[#allocation6 + $0xf0] sm:$0xff] }
 0x249   : > { %714 = vmatmul.mubr.f32.vlgmr.msra.gmra.mrb[2].mxu0 %v583_v16  ;;  %1496 = vmatmul.mubr.f32.vlgmr.msra.gmra.mrb[2].mxu1 %v583_v16  ;;  %v1718_v12 = vpack.c.bf16 %v904_v11, %v903_v10 }
 0x24a   : > { %1674 = vmatpush3.bf16.msra.mxu0 %v1673_v13  ;;  %1530 = vmatprep.mubr.msk.f32.mxu0 %vm1963_vm0, %v1964_v1  ;;  %v987_v13 = vld [vmem:[#allocation7 + $0x8] sm:$0xff] }
 0x24b   : > { %1675 = vmatprep.subr.bf16.mxu0 %v1962_v0  ;;  %1565 = vmatprep.mubr.msk.f32.mxu1 %vm1963_vm0, %v1964_v1  ;;  %v1720_v16 = vpack.c.bf16 %v989_v14, %v987_v13 }
 0x24c   : > { %1698 = vmatpush3.bf16.msra.mxu1 %v1697_v39  ;;  %v1004_v39 = vld [vmem:[#allocation7 + $0x90] sm:$0xff] }
 0x24d   : > { %1699 = vmatprep.subr.bf16.mxu1 %v1962_v0  ;;  %v1738_v42 = vpack.c.bf16 %v1004_v39, %v1002_v38 }
 0x24e   : > { %1677 = vmatpush3.bf16.msra.mxu0 %v1676_v17  ;;  %v988_v17 = vld [vmem:[#allocation7 + $0x10] sm:$0xff] }
 0x24f   : > { %1678 = vmatprep.subr.bf16.mxu0 %v1962_v0 }
 0x250   : > { %1701 = vmatpush3.bf16.msra.mxu1 %v1700_v41  ;;  %v1009_v41 = vld [vmem:[#allocation7 + $0xb8] sm:$0xff] }
 0x251   : > { %1702 = vmatprep.subr.bf16.mxu1 %v1962_v0  ;;  %v1740_v43 = vpack.c.bf16 %v1009_v41, %v1007_v40 }
 0x252   : > { %1680 = vmatpush3.bf16.msra.mxu0 %v1679_v20  ;;  %v1722_v20 = vpack.c.bf16 %v988_v17, %v986_v15  ;;  %v1018_v15 = vld [vmem:[%s2267_s8] sm:$0x3] }
 0x253   : > { %1681 = vmatprep.subr.bf16.mxu0 %v1962_v0  ;;  %v1027_v17 = vrot.slane %v1018_v15, %v640_v60  ;;  %v644_v60 = vsub.s32 2, %v2216_v59 }
 0x254   : > { %1704 = vmatpush3.bf16.msra.mxu1 %v1703_v44  ;;  %v1006_v44 = vld [vmem:[#allocation7 + $0xa0] sm:$0xff] }
 0x255   : > { %1705 = vmatprep.subr.bf16.mxu1 %v1962_v0  ;;  %v1742_v49 = vpack.c.bf16 %v1008_v45, %v1006_v44 }
 0x256   : > { %1683 = vmatpush3.bf16.msra.mxu0 %v1682_v23  ;;  %v992_v23 = vld [vmem:[#allocation7 + $0x30] sm:$0xff] }
 0x257   : > { %1684 = vmatprep.subr.bf16.mxu0 %v1962_v0 }
 0x258   : > { %1707 = vmatpush3.bf16.msra.mxu1 %v1706_v48  ;;  %v1013_v48 = vld [vmem:[#allocation7 + $0xd8] sm:$0xff] }
 0x259   : > { %1708 = vmatprep.subr.bf16.mxu1 %v1962_v0  ;;  %v1744_v50 = vpack.c.bf16 %v1013_v48, %v1011_v46 }
 0x25a   : > { %1686 = vmatpush3.bf16.msra.mxu0 %v1685_v26  ;;  %v994_v26 = vld [vmem:[#allocation7 + $0x40] sm:$0xff] }
 0x25b   : > { %1687 = vmatprep.subr.bf16.mxu0 %v1962_v0  ;;  %v1730_v30 = vpack.c.bf16 %v996_v27, %v994_v26 }
 0x25c   : > { %1710 = vmatpush3.bf16.msra.mxu1 %v1709_v51  ;;  %v1010_v51 = vld [vmem:[#allocation7 + $0xc0] sm:$0xff] }
 0x25d   : > { %1711 = vmatprep.subr.bf16.mxu1 %v1962_v0  ;;  %v1746_v53 = vpack.c.bf16 %v1012_v52, %v1010_v51 }
 0x25e   : > { %1689 = vmatpush3.bf16.msra.mxu0 %v1688_v29  ;;  %v1001_v29 = vld [vmem:[#allocation7 + $0x78] sm:$0xff] }
 0x25f   : > { %1690 = vmatprep.subr.bf16.mxu0 %v1962_v0  ;;  %v1732_v31 = vpack.c.bf16 %v1001_v29, %v999_v28  ;;  %v1102_v28 = vand.u32 127, %v634_v58 }
 0x260   : > { %1713 = vmatpush3.bf16.msra.mxu1 %v1712_v54  ;;  %v1300_v54 = vld [vmem:[%s2265_s6] ss:$0 sm:$0xff] }
 0x261   : > { %1714 = vmatprep.subr.bf16.mxu1 %v1962_v0  ;;  %v1103_v29 = vadd.s32 128, %v1102_v28  ;;  %vm1158_vm7 = vcmp.lt.s32.totalorder %v1102_v28, 64  ;;  %vm1162_vm8 = vcmp.ge.s32.totalorder %v1102_v28, 64 }
 0x262   : > { %1692 = vmatpush3.bf16.msra.mxu0 %v1691_v32  ;;  %v998_v32 = vld [vmem:[#allocation7 + $0x60] sm:$0xff] }
 0x263   : > { %1693 = vmatprep.subr.bf16.mxu0 %v1962_v0  ;;  %v1734_v36 = vpack.c.bf16 %v1000_v33, %v998_v32  ;;  %vm1175_vm5 = vcmp.lt.s32.totalorder %v1103_v29, 192 }
 0x264   : > { %1716 = vmatpush3.bf16.msra.mxu1 %v1715_v57 }
 0x265   : > { %1717 = vmatprep.subr.bf16.mxu1 %v1962_v0  ;;  %v637_v0 = vrot.slane %v2222_v61, %v636_v62 }
 0x266   : > { %1695 = vmatpush3.bf16.msra.mxu0 %v1694_v35  ;;  %v1005_v35 = vld [vmem:[#allocation7 + $0x98] sm:$0xff] }
 0x267   : > { %1721 = vmatprep.subr.bf16.mxu0 %v1720_v16  ;;  %v1736_v37 = vpack.c.bf16 %v1005_v35, %v1003_v34  ;;  %v1023_v16 = vrot.slane %v1018_v15, %v636_v62 }
 0x268   : > { %1719 = vmatpush3.bf16.msra.mxu1 %v1718_v12 }
 0x31c   : > { %v715_v2 = vpop.f32.mrb[2].mxu0  ;;  %v2231_v3 = vpop.f32.mrb[2].mxu1 }
 0x31d   : > { %v717_v4 = vpop.f32.mrb[3].mxu0  ;;  %v1497_v5 = vpop.f32.mrb[3].mxu1  ;;  %v716_v7 = vadd.f32 %v715_v2, %v637_v0  ;;  %v1015_v2 = vld [vmem:[#allocation7 + $0xe8] sm:$0xff] }
 0x31e   : > { %v718_v6 = vadd.f32 %v717_v4, %v641_v63  ;;  %v1017_v4 = vld [vmem:[#allocation7 + $0xf8] sm:$0xff] }
 0x31f   : > { %v1748_v5 = vpack.c.bf16 %v1017_v4, %v1015_v2 }
 0x320   : > { %v790_v8 = vmul.f32 %v718_v6, %v2174_v47  ;;  %v995_v47 = vld [vmem:[#allocation7 + $0x48] sm:$0xff]  ;;  %v1014_v6 = vld [vmem:[#allocation7 + $0xe0] sm:$0xff] }
 0x321   : > { %v1728_v25 = vpack.c.bf16 %v997_v24, %v995_v47 }
 0x322   : > { %v791_v9 = vadd.f32 %v790_v8, %v716_v7  ;;  %v1016_v7 = vld [vmem:[#allocation7 + $0xf0] sm:$0xff] }
 0x323   : > { %v1750_v8 = vpack.c.bf16 %v1016_v7, %v1014_v6 }
 0x324   : > { %1531 = vmatmul.mubr.f32.vlgmr.msra.gmra.mrb[4].mxu0 %v791_v9  ;;  %v1302_v9 = vld [vmem:[%s2265_s6 + $0x1] ss:$0 sm:$0xff] }
 0x325   : > { %1094 = vmatprep.mubr.f32.mxu0 %v1964_v1  ;;  %1723 = vmatpush1.bf16.msra.mxu0 %v1722_v20  ;;  %v1726_v1 = vpack.c.bf16 %v992_v23, %v990_v22 }
 0x326   : > { %1725 = vmatprep.subr.bf16.mxu0 %v1724_v21 }
 0x329   : > { %1727 = vmatpush1.bf16.msra.mxu0 %v1726_v1 }
 0x32a   : > { %1729 = vmatprep.subr.bf16.mxu0 %v1728_v25 }
 0x32d   : > { %1731 = vmatpush1.bf16.msra.mxu0 %v1730_v30  ;;  %v645_v30 = vrot.slane %v2222_v61, %v644_v60 }
 0x32e   : > { %1733 = vmatprep.subr.bf16.mxu0 %v1732_v31 }
 0x32f   : > { %v787_v33 = vadd.f32 %v2231_v3, %v645_v30 }
 0x331   : > { %1735 = vmatpush1.bf16.msra.mxu0 %v1734_v36 }
 0x332   : > { %1737 = vmatprep.subr.bf16.mxu0 %v1736_v37 }
 0x335   : > { %1739 = vmatpush1.bf16.msra.mxu0 %v1738_v42 }
 0x336   : > { %1741 = vmatprep.subr.bf16.mxu0 %v1740_v43 }
 0x339   : > { %1743 = vmatpush1.bf16.msra.mxu0 %v1742_v49 }
 0x33a   : > { %1745 = vmatprep.subr.bf16.mxu0 %v1744_v50 }
 0x33d   : > { %1747 = vmatpush1.bf16.msra.mxu0 %v1746_v53 }
 0x33e   : > { %1749 = vmatprep.subr.bf16.mxu0 %v1748_v5 }
 0x341   : > { %1751 = vmatpush1.bf16.msra.mxu0 %v1750_v8 }
 0x3f7   : > { %v881_v55 = vpop.f32.mrb[4].mxu0 }
 0x3f8   : > { %v882_v56 = vadd.f32 %v1300_v54, %v881_v55  ;;  %v1532_v57 = vpop.f32.mrb[5].mxu0 }
 0x3fa   : > { %vm885_vm3 = vcmp.ge.f32.partialorder %v882_v56, 0.0  ;;  %v886_v63 = vmul.f32 0.2, %v882_v56 }
 0x3fc   : > { %v887_v0 = vsel %vm885_vm3, %v882_v56, %v886_v63 }
 0x3fd   : > { %1566 = vmatmul.mubr.f32.vlgmr.msra.gmra.mrb[4].mxu1 %v887_v0 }
 0x4d0   : > { %v979_v10 = vpop.f32.mrb[4].mxu1 }
 0x4d1   : > { %v980_v11 = vadd.f32 %v1302_v9, %v979_v10  ;;  %v1567_v12 = vpop.f32.mrb[5].mxu1 }
 0x4d3   : > { %vm983_vm4 = vcmp.ge.f32.partialorder %v980_v11, 0.0  ;;  %v984_v13 = vmul.f32 0.2, %v980_v11 }
 0x4d5   : > { %v985_v14 = vsel %vm983_vm4, %v980_v11, %v984_v13 }
 0x4d6   : > { %1095 = vmatmul.mubr.f32.vlgmr.msra.gmra.mrb[6].mxu0 %v985_v14 }
 0x5a9   : > { %v1096_v18 = vpop.f32.mrb[6].mxu0 }
 0x5aa   : > { %v1097_v19 = vadd.f32 %v1096_v18, %v1023_v16  ;;  %v1098_v20 = vpop.f32.mrb[7].mxu0 }
 0x5ab   : > { %v1099_v21 = vadd.f32 %v1098_v20, %v1027_v17 }
 0x5ac   : > { %v1114_v22 = vand.u32 2147483647, %v1097_v19  ;;  %v1104_v25 = vmul.f32 1.442695, %v1097_v19  ;;  %v1112_v40 = vmax.f32 %v1097_v19, 0.0 }
 0x5ad   : > { %v1304_v23 = vmul.f32 -1.442695, %v1099_v21 }
 0x5ae   : > { %v1116_v47 = vsub.f32 0.0, %v1114_v22 }
 0x5af   : > { %1810 = vpow2.f32 %v1304_v23 }
 0x5b0   : > { %v1118_v24 = vmul.f32 1.442695, %v1116_v47 }
 0x5b2   : > { %1812 = vpow2.f32 %v1118_v24 }
 0x5b9   : > { %v1811_v1 = vpop.eup %1810 }
 0x5ba   : > { %v1153_v26 = vadd.f32 1.0, %v1811_v1 }
 0x5bc   : > { %v1813_v27 = vpop.eup %1812  ;;  %1814 = vrcp.f32 %v1153_v26 }
 0x5bd   : > { %v1122_v62 = vadd.f32 1.0, %v1813_v27  ;;  %1816 = vpow2.f32 %v1104_v25  ;;  %v1125_v31 = vmul.f32 -0.5, %v1813_v27  ;;  %v1128_v35 = vand.u32 2147483647, %v1813_v27 }
 0x5bf   : > { %1818 = vlog2.f32 %v1122_v62  ;;  %v1126_v34 = vadd.f32 1.0, %v1125_v31  ;;  %vm1129_vm6 = vcmp.lt.f32.partialorder %v1128_v35, 0.0004427343 }
 0x5c1   : > { %v1127_v39 = vmul.f32 %v1813_v27, %v1126_v34 }
 0x5c6   : > { %v1815_v32 = vpop.eup %1814 }
 0x5c7   : > { %v1179_v58 = vsel %vm1175_vm5, %v1815_v32, 0.0  ;;  %v1817_v36 = vpop.eup %1816 }
 0x5c8   : > { %v1183_v59 = vadd.f32 %v1179_v58, %v787_v33  ;;  %v1108_v61 = vmax.f32 %v1817_v36, 1e-05 }
 0x5c9   : > { %v1819_v37 = vpop.eup %1818 }
 0x5ca   : > { %v1124_v38 = vmul.f32 0.6931472, %v1819_v37  ;;  %1184 = vst [vmem:[%s388_s13 + $0x8] sm:$0xff] %v1183_v59  ;;  %v1110_v43 = vmin.f32 %v1108_v61, 1000000.0 }
 0x5cc   : > { %v1130_v41 = vsel %vm1129_vm6, %v1127_v39, %v1124_v38  ;;  %v1160_v45 = vsel %vm1158_vm7, %v1110_v43, 0.0 }
 0x5cd   : > { %v1140_v42 = vadd.f32 %v1130_v41, %v1112_v40 }
 0x5cf   : > { %v1142_v3 = vmax.f32 %v1140_v42, 0.0001 }
 0x5d1   : > { %v1144_v44 = vmin.f32 %v1142_v3, 10000.0 }
 0x5d3   : > { %v1168_v46 = vsel %vm1162_vm8, %v1144_v44, 0.0 }
 0x5d4   : > { %v1170_v48 = vadd.f32 %v1168_v46, %v1160_v45 }
 0x5d6   : > { %1182 = vst [vmem:[%s388_s13] sm:$0xff] %v1170_v48 }
 0x5d7 PF: > { %s22_s30 = sadd.s32 1, %s1950_s30  }
 0x5d8   : > { %p19_p1 = scmp.ge.s32.totalorder %s22_s30, 4  }
 0x5da   :  { %21 = sbr.rel (!%p19_p1) target bundleno = 3 (0x3), region = 107 }
 0x5e1   :  { %1206 = vsyncpa [#allocation3], 1 }
 0x5e2   :  { %1208 = vsyncpa [#allocation3 + $0x1], 1 }
 0x5e3   :  { %1209 = vsyncpa [#allocation5], 1 }
 0x5e4   :  { %1210 = vsyncpa [#allocation8], 1 }

</bundles_post_ra>
